<compile_context>
chip_gen: v5e
topology: v5e:2x2
jax: 0.10.0
libtpu: 0.0.40
codegen_flags: <defaults>
</compile_context>

<pallas_src>
import functools

import jax
import jax.numpy as jnp
from jax.experimental import pallas as pl
from jax.experimental.pallas import tpu as pltpu

DEFAULT_COEF = 0.97


def _preemphasis_kernel(prev_ref, x_ref, o_ref, *, coef):
    # prev_ref: (1, b_tile, 1)  left-neighbor column for this (batch, time) tile
    #                           (time-tile 0 carries the reflect value x[:, 1]).
    # x_ref, o_ref: (b_tile, t_tile)
    x = x_ref[...]
    t_tile = x.shape[-1]
    left = prev_ref[0]                                        # (b_tile, 1)
    # prev[:, 0] = left neighbor; prev[:, t] = x[:, t-1] for t >= 1.
    prev = jnp.concatenate([left, x[:, : t_tile - 1]], axis=1)
    # Single full-width lane-dense store; exactly 1 mul + 1 sub per element.
    o_ref[...] = x - coef * prev


def _select_tiles(B, T, itemsize, target_block_bytes, min_grid_steps):
    """Byte-aware (b_tile, t_tile) selection + grid extents."""
    # --- batch tile: full B when cheap, else a multiple of 8 (decouples VMEM from B)
    lane_bytes = 128 * itemsize
    if B <= 8 or B * lane_bytes <= target_block_bytes:
        b_tile = B
    else:
        b_tile = max(8, (target_block_bytes // lane_bytes) // 8 * 8)
        b_tile = min(b_tile, B)
    grid_b = pl.cdiv(B, b_tile)

    # --- time tile: largest multiple of 128 within the byte budget ---
    t_tile = max(128, (target_block_bytes // (b_tile * itemsize)) // 128 * 128)
    # never larger than the array (tail blocks handled by cdiv + masked stores)
    t_cap = (T // 128) * 128 if T >= 128 else T
    t_tile = min(t_tile, t_cap)
    # ensure enough parallel grid steps for v7x megacore sharding when possible
    want_t_steps = pl.cdiv(min_grid_steps, grid_b)
    if want_t_steps > 1 and T >= 128:
        t_lanes = pl.cdiv(T, 128)
        t_tile = min(t_tile, max(128, pl.cdiv(t_lanes, want_t_steps) * 128))
    grid_t = pl.cdiv(T, t_tile)
    return b_tile, t_tile, grid_b, grid_t


def preemphasis_ref(x: jax.Array, coef: float = DEFAULT_COEF) -> jax.Array:
    """Pure-JAX reference mirroring the PyTorch module (also the small-input path)."""
    padded = jnp.concatenate([x[:, 1:2], x], axis=1)   # reflect pad left by 1
    return padded[:, 1:] - coef * padded[:, :-1]


def preemphasis(x: jax.Array, coef: float = DEFAULT_COEF, *,
                target_block_bytes: int = 4 << 20,
                min_grid_steps: int = 4,
                small_input_bytes: int = 256 << 10,
                force_pallas: bool = False) -> jax.Array:
    """Pre-emphasis filter. x: (B, T), T >= 2 (PyTorch reflect-pad requirement)."""
    B, T = x.shape
    if T < 2:
        raise ValueError("PreEmphasis reflect padding requires T >= 2.")
    itemsize = jnp.dtype(x.dtype).itemsize

    # Small-input fast path: pallas_call fixed costs exceed the work.
    if not force_pallas and B * T * itemsize <= small_input_bytes:
        return preemphasis_ref(x, coef)

    b_tile, t_tile, grid_b, grid_t = _select_tiles(
        B, T, itemsize, target_block_bytes, min_grid_steps)

    # Left-neighbor column for every time tile (computed once, XLA-side), so
    # every grid step is independent and both grid axes stay "parallel":
    #   tile 0      -> x[:, 1]              (reflect padding)
    #   tile j >= 1 -> x[:, j*t_tile - 1]   (last column of previous tile)
    first = x[:, 1:2]                                          # (B, 1)
    if grid_t > 1:
        rest = x[:, t_tile - 1: T - 1: t_tile]                 # (B, grid_t - 1)
        prev_cols = jnp.concatenate([first, rest], axis=1)     # (B, grid_t)
    else:
        prev_cols = first
    prev_cols = jnp.transpose(prev_cols)[:, :, None]           # (grid_t, B, 1)

    kernel = functools.partial(_preemphasis_kernel, coef=coef)
    block_bytes = b_tile * t_tile * itemsize
    # ~2 input + 2 output pipelined buffers + tiny prev buffers + slack.
    vmem_limit = int(min(max(5 * block_bytes + (2 << 20), 8 << 20), 48 << 20))

    return pl.pallas_call(
        kernel,
        out_shape=jax.ShapeDtypeStruct((B, T), x.dtype),
        grid_spec=pltpu.PrefetchScalarGridSpec(
            num_scalar_prefetch=0,
            grid=(grid_b, grid_t),
            in_specs=[
                pl.BlockSpec((1, b_tile, 1), lambda b, j: (j, b, 0)),   # neighbor col
                pl.BlockSpec((b_tile, t_tile), lambda b, j: (b, j)),    # input tile
            ],
            out_specs=pl.BlockSpec((b_tile, t_tile), lambda b, j: (b, j)),
        ),
        compiler_params=pltpu.CompilerParams(
            dimension_semantics=("parallel", "parallel"),
            vmem_limit_bytes=vmem_limit,
        ),
        cost_estimate=pl.CostEstimate(
            flops=2 * B * T,
            transcendentals=0,
            bytes_accessed=2 * B * T * itemsize + grid_t * B * itemsize,
        ),
    )(prev_cols, x)


if __name__ == "__main__":
    key = jax.random.PRNGKey(0)
    k1, k2, k3 = jax.random.split(key, 3)

    # 1) Non-divisible T (2000): exercises cdiv tail masking, cross-tile boundary
    #    columns and the pipelined 2-axis parallel grid.
    B1, T1 = 8, 2000
    x1 = jax.random.normal(k1, (B1, T1), dtype=jnp.float32)
    y1 = preemphasis(x1, force_pallas=True)
    jax.block_until_ready(y1)
    assert y1.shape == (B1, T1)
    assert jnp.allclose(y1, preemphasis_ref(x1), atol=1e-6, rtol=1e-6), \
        "non-divisible-T mismatch vs reference"

    # 2) Divisible T, multi-tile path.
    B2, T2 = 4, 2048
    x2 = jax.random.normal(k2, (B2, T2), dtype=jnp.float32)
    y2 = preemphasis(x2, force_pallas=True)
    jax.block_until_ready(y2)
    assert y2.shape == (B2, T2)
    assert jnp.allclose(y2, preemphasis_ref(x2), atol=1e-6, rtol=1e-6), \
        "multi-tile mismatch vs reference"

    # 3) Small-input fast path (pure fused XLA, no pallas_call).
    B3, T3 = 4, 256
    x3 = jax.random.normal(k3, (B3, T3), dtype=jnp.float32)
    y3 = preemphasis(x3)
    jax.block_until_ready(y3)
    assert y3.shape == (B3, T3)
    assert jnp.allclose(y3, preemphasis_ref(x3), atol=1e-6, rtol=1e-6), \
        "fast-path mismatch vs reference"

    print("KERNEL_OK")
</pallas_src>

<mosaic_0001>
module attributes {stable_mosaic.version = 11 : i64} {
  func.func @_preemphasis_kernel(%arg0: i32, %arg1: i32, %arg2: memref<1x8x1xf32, #tpu.memory_space<vmem>>, %arg3: memref<8x512xf32, #tpu.memory_space<vmem>>, %arg4: memref<8x512xf32, #tpu.memory_space<vmem>>) attributes {dimension_semantics = [#tpu.dimension_semantics<parallel>, #tpu.dimension_semantics<parallel>], iteration_bounds = array<i64: 1, 4>, scalar_prefetch = 0 : i64, scratch_operands = 0 : i64, tpu.core_type = #tpu.core_type<tc>, window_params = [{transform_indices = @transform_0, window_bounds = array<i64: 1, 8, 1>}, {transform_indices = @transform_1, window_bounds = array<i64: 8, 512>}, {transform_indices = @transform_2, window_bounds = array<i64: 8, 512>}]} {
    %c0 = arith.constant 0 : index
    %c0_0 = arith.constant 0 : index
    %0 = vector.load %arg3[%c0, %c0_0] : memref<8x512xf32, #tpu.memory_space<vmem>>, vector<8x512xf32>
    %c0_1 = arith.constant 0 : index
    %c0_2 = arith.constant 0 : index
    %c0_3 = arith.constant 0 : index
    %1 = vector.load %arg2[%c0_1, %c0_2, %c0_3] : memref<1x8x1xf32, #tpu.memory_space<vmem>>, vector<1x8x1xf32>
    %2 = vector.shape_cast %1 : vector<1x8x1xf32> to vector<8x1xf32>
    %3 = vector.extract_strided_slice %0 {offsets = [0, 0], sizes = [8, 511], strides = [1, 1]} : vector<8x512xf32> to vector<8x511xf32>
    %4 = tpu.concatenate %2, %3 in 1 : vector<8x1xf32>, vector<8x511xf32> -> vector<8x512xf32>
    %cst = arith.constant 9.700000e-01 : f32
    %5 = vector.broadcast %cst : f32 to vector<8x512xf32>
    %6 = arith.mulf %5, %4 : vector<8x512xf32>
    %7 = arith.subf %0, %6 : vector<8x512xf32>
    %c0_4 = arith.constant 0 : index
    %c0_5 = arith.constant 0 : index
    %8 = vector.load %arg4[%c0_4, %c0_5] : memref<8x512xf32, #tpu.memory_space<vmem>>, vector<8x512xf32>
    tpu.vector_store %arg4[%c0_4, %c0_5], %7 {strides = array<i32>} : memref<8x512xf32, #tpu.memory_space<vmem>>, vector<8x512xf32>,
    return
  }
  func.func @transform_0(%arg0: i32, %arg1: i32) -> (i32, i32, i32) {
    %c0_i32 = arith.constant 0 : i32
    %c0_i32_0 = arith.constant 0 : i32
    return %arg1, %arg0, %c0_i32 : i32, i32, i32
  }
  func.func @transform_1(%arg0: i32, %arg1: i32) -> (i32, i32) {
    %c0_i32 = arith.constant 0 : i32
    return %arg0, %arg1 : i32, i32
  }
  func.func @transform_2(%arg0: i32, %arg1: i32) -> (i32, i32) {
    %c0_i32 = arith.constant 0 : i32
    return %arg0, %arg1 : i32, i32
  }
}

</mosaic_0001>

<bundles_post_ra>
// kernel: tpu_custom_call.1
= control target key start
LH: loop header
LB: loop body
LE: loop exit
PB: predicated region body
PF: predicated region fallthrough
CT: control target
= control target key end

     0   :  { %7 = vsyncpa [#allocation3], 0  ;;  %s700_s0 = inlined_call_operand.vmem [shape: f32[4,8,1], index: 0, kind: input, shape index: {}]   ;;  %s701_s1 = inlined_call_operand.hbm [shape: f32[8,2000], index: 1, kind: input, shape index: {}]   ;;  %s702_s2 = inlined_call_operand.hbm [shape: f32[8,2000], index: 2, kind: output, shape index: {}]  }
   0x1   :  { %9 = vsyncpa [#allocation3 + $0x1], 0 }
   0x2   :  { %10 = vsyncpa [#allocation4], 0 }
   0x3   :  { %12 = vsyncpa [#allocation4 + $0x1], 0  ;;  %s577_s9 = smov 0   ;;  %s579_s10 = smov 0  }
   0x4   :  { %s581_s11 = smov 0   ;;  %s583_s12 = smov 0  }
   0x5   :  { %s585_s13 = smov 0   ;;  %s587_s14 = smov 0  }
   0x6 LB: > { %s366_s15 = sadd.s32 4294967295, %s559_s14   ;;  %s367_s16 = sadd.s32 4294967294, %s559_s14   ;;  %s559_s14 = sphi %s587_s14, %s18_s14   ;;  %s555_s13 = sphi %s585_s13, %s711_s13   ;;  %s551_s12 = sphi %s583_s12, %s710_s12   ;;  %s547_s11 = sphi %s581_s11, %s709_s11   ;;  %s543_s10 = sphi %s579_s10, %s708_s10   ;;  %s539_s9 = sphi %s577_s9, %s707_s9  }
   0x7   : > { %s27_s17 = sadd.s32 1, %s555_s13  ;;  %s67_s18 = sadd.s32 1, %s547_s11 }
   0x8   : > { %p28_p0 = scmp.ge.s32.totalorder %s27_s17, 4  ;;  %p74_p1 = scmp.ne.s32.totalorder %s547_s11, %s543_s10 }
   0x9   : > { %p75_p2 = scmp.eq.s32.totalorder %s559_s14, 0  ;;  %p80_p3 = scmp.ne.s32.totalorder %s543_s10, %s539_s9 }
   0xa   : > { %s713_s17 = smov (%p28_p0, %s27_s17), 0  ;;  %p81_p5 = scmp.eq.s32.totalorder %s366_s15, 0 }
   0xb   : > { %p618_p4 = por %p75_p2, %p74_p1  ;;  %s63_s20 = ssub.s32 %s555_s13, %s713_s17 }
   0xc   : > { %p106_p6 = scmp.eq.s32.totalorder %s366_s15, 3  ;;  %p65_p7 = scmp.eq.s32.totalorder %s63_s20, 0 }
   0xd   : > { %p624_p8 = por %p81_p5, %p80_p3  ;;  %p112_p10 = scmp.eq.s32.totalorder %s367_s16, 3 }
   0xe   : > { %p628_p9 = por %p106_p6, %p74_p1  ;;  %p396_p12 = scmp.lt.s32.totalorder %s559_s14, 4 }
   0xf   : > { %s633_s23 = scalar_select %p65_p7, %s547_s11, %s67_s18  }
  0x10   : > { %p635_p11 = por %p112_p10, %p80_p3  ;;  %s142_s25 = sand.u32 1, %s547_s11  }
  0x11   : > { %s370_s26 = sshll.u32 %s142_s25, 5  ;;  %s382_s27 = sshll.u32 %s555_s13, 5 }
  0x12   : > { %s153_s30 = scalar_lea.hbm %s701_s1, %s382_s27  ;;  %s146_s3 = scalar_lea.vmem [#allocation2], %s370_s26 }
  0x13   : > { %s157_s4 = sshll.u32 %s146_s3, 4  ;;  %s155_s5 = sshll.u32 %s153_s30, 4  ;;  %s158_s4 = int_to_ptr.vmem [resolvable:$true] %s157_s4  ;;  %s156_s5 = int_to_ptr.hbm [resolvable:$true] %s155_s5 }
  0x14   : > { %p389_p13 = pnand %p396_p12, %p618_p4  ;;  %p373_p0 = scmp.ge.s32.totalorder %s559_s14, 1 }
  0x15   : > { %p162_p1 = scmp.lt.s32.totalorder %s559_s14, 5  ;;  %s143_s6 = scalar_lea.sflag [#allocation3], %s142_s25 }
  0x16   : > { %391 = dma.hbm_to_vmem [thread:$0]  (!%p389_p13), %s156_s5, 512, %s158_s4, %s143_s6  }
  0x17   : > { %p163_p2 = pnand %p373_p0, %p162_p1 }
  0x18   : > { %s650_s7 = sand.u32 (!%p163_p2), 1, %s543_s10  }
  0x19   : > { %166 = sbr.rel (%p163_p2) target bundleno = 165 (0xa5), region = 28  ;;  %s374_s8 = sshll.u32 (!%p163_p2), %s650_s7, 5 }
  0x1a   : > { %s169_s15 = scalar_lea.sflag (!%p163_p2), [#allocation3], %s650_s7  ;;  %s172_s16 = scalar_lea.vmem (!%p163_p2), [#allocation2], %s374_s8 }
  0x1e   : > { %530 = dma.done.wait (%p624_p8), %s169_s15, 512  }
  0x1f   : > { %532 = vsyncadd (%p624_p8), %s169_s15, 4294966784  ;;  %v212_v0 = vld [vmem:[%s172_s16 + $0x10] sm:$0xff]  ;;  %v210_v1 = vld [vmem:[%s172_s16] sm:$0xff]  ;;  %s561_s18 = smov 1   ;;  %p201_p3 = scmp.lt.s32.totalorder %s551_s12, 3  ;;  %vm227_vm0 = vcmask 7168  }
  0x20   : > { %223 = vrot.lane.b32.xlu1 %v212_v0, %s561_s18  ;;  %219 = vrot.lane.b32.xlu0 %v210_v1, %s561_s18  ;;  %v213_v2 = vld [vmem:[%s172_s16 + $0x18] sm:$0xff]  ;;  %v211_v3 = vld [vmem:[%s172_s16 + $0x8] sm:$0xff]  ;;  %s383_s27 = sshll.u32 %s551_s12, 5  ;;  %s200_s28 = scalar_lea.vmem [#allocation5], %s374_s8 }
  0x21   : > { %s202_s19 = scalar_select %p201_p3, %s551_s12, 3 }
  0x22   : > { %s262_s3 = scalar_lea.hbm %s702_s2, %s383_s27  ;;  %s264_s4 = sshll.u32 %s200_s28, 4  ;;  %s265_s4 = int_to_ptr.vmem [resolvable:$true] %s264_s4 }
  0x23   : > { %s376_s20 = sshll.u32 %s202_s19, 3  ;;  %s266_s5 = sshll.u32 %s262_s3, 4  ;;  %s267_s5 = int_to_ptr.hbm [resolvable:$true] %s266_s5 }
  0x24   : > { %s207_s21 = scalar_lea.vmem %s700_s0, %s376_s20  ;;  %s249_s12 = scalar_lea.sflag [#allocation4], %s650_s7 }
  0x25   : > { %v214_v4 = vld [vmem:[%s207_s21] sm:$0xff]  ;;  %s491_s6 = sshra.s32 %s267_s5, 4  ;;  %s492_s6 = int_to_ptr.hbm [resolvable:$true] %s491_s6 }
  0x26   : > { %s493_s8 = scalar_lea.hbm %s492_s6, 32  ;;  %p498_p7 = scmp.lt.s32.totalorder %s492_s6, %s702_s2 }
  0x27   : > { %p494_p4 = scmp.ne.s32.totalorder %s492_s6, %s493_s8 }
  0x28   : > { %225 = vrot.lane.b32.xlu1 %v213_v2, %s561_s18  ;;  %221 = vrot.lane.b32.xlu0 %v211_v3, %s561_s18  ;;  %s497_s18 = scalar_lea.hbm %s702_s2, 128 }
  0x29   : > { %p495_p5 = pnand %p494_p4, %p628_p9  ;;  %p499_p8 = scmp.lt.s32.totalorder %s497_s18, %s493_s8 }
  0x2b   : > { %p496_p6 = pneg %p495_p5  ;;  %p500_p10 = por %p499_p8, %p498_p7 }
  0x2d   : > { %p501_p12 = pnand %p500_p10, %p496_p6 }
  0x92   : > { %v224_v5 = vpop.permute.xlu1 %223  ;;  %v220_v6 = vpop.permute.xlu0 %219 }
  0x93   : > { %v235_v7 = vsel %vm227_vm0, %v214_v4, %v220_v6 }
  0x94   : > { %v236_v8 = vmul.f32 0.97, %v235_v7 }
  0x96   : > { %v240_v9 = vsub.f32 %v210_v1, %v236_v8 }
  0x98   : > { %244 = vst [vmem:[%s200_s28] sm:$0xff] %v240_v9 }
  0x9a   : > { %v226_v10 = vpop.permute.xlu1 %225  ;;  %v222_v11 = vpop.permute.xlu0 %221 }
  0x9b   : > { %v230_v12 = vsel %vm227_vm0, %v224_v5, %v226_v10  ;;  %v228_v13 = vsel %vm227_vm0, %v220_v6, %v222_v11  ;;  %v229_v14 = vsel %vm227_vm0, %v222_v11, %v224_v5 }
  0x9c   : > { %v239_v15 = vmul.f32 0.97, %v230_v12  ;;  %v237_v16 = vmul.f32 0.97, %v228_v13  ;;  %v238_v17 = vmul.f32 0.97, %v229_v14 }
  0x9e   : > { %v243_v18 = vsub.f32 %v213_v2, %v239_v15  ;;  %v241_v19 = vsub.f32 %v211_v3, %v237_v16  ;;  %v242_v20 = vsub.f32 %v212_v0, %v238_v17 }
  0xa0   : > { %247 = vst [vmem:[%s200_s28 + $0x18] sm:$0xff] %v243_v18 }
  0xa1   : > { %245 = vst [vmem:[%s200_s28 + $0x8] sm:$0xff] %v241_v19 }
  0xa2   : > { %246 = vst [vmem:[%s200_s28 + $0x10] sm:$0xff] %v242_v20 }
  0xa3   : > { %504 = shalt.err (!%p501_p12)
}
  0xa4   : > { %386 = dma.vmem_to_hbm [thread:$0]  (%p628_p9), %s265_s4, 512, %s267_s5, %s249_s12  }
  0xa5 PF: > { %p397_p13 = scmp.ge.s32.totalorder %s559_s14, 2  ;;  %s278_s7 = sand.u32 1, %s539_s9  }
  0xa6   : > { %s279_s25 = scalar_lea.sflag [#allocation4], %s278_s7 }
  0xa7   : > { %p393_p0 = pnand %p397_p13, %p635_p11 }
  0xa9   : > { %p394_p1 = pneg %p393_p0 }
  0xab   : > { %534 = dma.done.wait (%p394_p1), %s279_s25, 512  }
  0xac   : > { %536 = vsyncadd (%p394_p1), %s279_s25, 4294966784  ;;  %s18_s14 = sadd.s32 1, %s559_s14   ;;  %s707_s9 = smov %s543_s10 }
  0xad   : > { %p15_p2 = scmp.ge.s32.totalorder %s18_s14, 6   ;;  %s708_s10 = smov %s547_s11 }
  0xae   : > { %s709_s11 = smov %s633_s23  ;;  %s710_s12 = smov %s555_s13 }
  0xaf   : > { %s711_s13 = smov %s713_s17  ;;  %17 = sbr.rel (!%p15_p2) target bundleno = 6 (0x6), region = 76 }
  0xb4   :  { %285 = vsyncpa [#allocation3], 1 }
  0xb5   :  { %287 = vsyncpa [#allocation3 + $0x1], 1 }
  0xb6   :  { %288 = vsyncpa [#allocation4], 1 }
  0xb7   :  { %290 = vsyncpa [#allocation4 + $0x1], 1 }

</bundles_post_ra>
